<compile_context>
chip_gen: v7x
topology: tpu7x:2x2x1
jax: 0.10.0
libtpu: 0.0.40
codegen_flags: <defaults>
</compile_context>

<pallas_src>
import functools

import jax
import jax.numpy as jnp
from jax.experimental import pallas as pl
from jax.experimental.pallas import tpu as pltpu

NEG_SLOPE = 0.01  # F.leaky_relu default used by the reference PyTorch module.


# ---------------------------------------------------------------------------
# Kernel 1: fused all-heads projection + folded attention mat-vecs.
# ---------------------------------------------------------------------------
def _proj_kernel(h_ref, wz_ref, wa_ref, z_ref, s_ref):
    hb = h_ref[...]                                              # (Tn, in_dim) f32
    # bf16 MXU inputs (f32 x f32 would lower to ~3 bf16 passes), f32 accumulate.
    z = jnp.dot(hb.astype(jnp.bfloat16), wz_ref[...],
                preferred_element_type=jnp.float32)
    z_ref[...] = z.astype(z_ref.dtype)                           # bf16 for later MXU use
    # s[:, :H] = z_h . a_src_h,  s[:, H:] = z_h . a_dst_h (folded into x @ (W^T a)),
    # kept in f32 for attention-score precision.
    s_ref[...] = jnp.dot(hb, wa_ref[...], preferred_element_type=jnp.float32)


def _projection(x, w_z_bf16, w_a, *, node_tile):
    n, in_dim = x.shape
    hd = w_z_bf16.shape[1]
    two_h = w_a.shape[1]
    return pl.pallas_call(
        _proj_kernel,
        out_shape=(
            jax.ShapeDtypeStruct((n, hd), jnp.bfloat16),
            jax.ShapeDtypeStruct((n, two_h), jnp.float32),
        ),
        grid_spec=pltpu.PrefetchScalarGridSpec(
            num_scalar_prefetch=0,
            grid=(n // node_tile,),
            in_specs=[
                pl.BlockSpec((node_tile, in_dim), lambda i: (i, 0)),
                pl.BlockSpec((in_dim, hd), lambda i: (0, 0)),     # weights stay resident
                pl.BlockSpec((in_dim, two_h), lambda i: (0, 0)),
            ],
            out_specs=(
                pl.BlockSpec((node_tile, hd), lambda i: (i, 0)),
                pl.BlockSpec((node_tile, two_h), lambda i: (i, 0)),
            ),
        ),
        compiler_params=pltpu.CompilerParams(
            dimension_semantics=("parallel",),
            vmem_limit_bytes=32 * 1024 * 1024,
        ),
    )(x, w_z_bf16, w_a)


# ---------------------------------------------------------------------------
# Kernel 2: GAT attention over (dst_tile [parallel], src_tile [arbitrary,
# innermost]).  Row max is precomputed (leaky_relu is monotone), so each step
# is just: broadcast-add scores, leaky_relu, exp, row-sum, MXU weighted sum.
# The (Td, H*D) f32 output block is the accumulator; finalize divides by the
# per-head denominator once per dst tile.
# ---------------------------------------------------------------------------
def _gat_attn_kernel(num_heads, out_dim,
                     sd_ref, s_srcT_ref, z_src_ref, o_ref, l_scr):
    s_idx = pl.program_id(1)

    @pl.when(s_idx == 0)
    def _init():
        l_scr[...] = jnp.zeros_like(l_scr)
        o_ref[...] = jnp.zeros_like(o_ref)

    sd = sd_ref[...]                                             # (Td, 2H): [s_dst | rowmax]
    contribs = []
    sums = []
    for h in range(num_heads):                                   # small H, unrolled
        # rank-1 broadcast add on the VPU: e[v, u] = s_dst_h[v] + s_src_h[u]
        e = sd[:, h:h + 1] + s_srcT_ref[h:h + 1, :]              # (Td, Ts) f32
        e = jnp.maximum(e, NEG_SLOPE * e)                        # leaky_relu(0.01)
        p = jnp.exp(e - sd[:, num_heads + h:num_heads + h + 1])  # stable: rowmax precomputed
        sums.append(jnp.sum(p, axis=1, keepdims=True))           # (Td, 1)
        z_h = z_src_ref[:, h * out_dim:(h + 1) * out_dim]        # (Ts, D) bf16
        contribs.append(jnp.dot(p.astype(jnp.bfloat16), z_h,
                                preferred_element_type=jnp.float32))
    l_scr[...] += jnp.concatenate(sums, axis=1)                  # (Td, H)
    o_ref[...] += jnp.concatenate(contribs, axis=1)              # (Td, H*D) lane-dense add

    @pl.when(s_idx == pl.num_programs(1) - 1)
    def _finalize():
        inv = pl.reciprocal(l_scr[...], approx=True)             # EUP, not VALU divide
        acc = o_ref[...]
        outs = [acc[:, h * out_dim:(h + 1) * out_dim] * inv[:, h:h + 1]
                for h in range(num_heads)]
        o_ref[...] = jnp.concatenate(outs, axis=1)               # one lane-dense store


def _gat_attention(z_bf16, s_srcT, sd, *, num_heads, out_dim,
                   dst_tile, src_tile):
    n, hd = z_bf16.shape
    kern = functools.partial(_gat_attn_kernel, num_heads, out_dim)
    return pl.pallas_call(
        kern,
        out_shape=jax.ShapeDtypeStruct((n, hd), jnp.float32),
        grid_spec=pltpu.PrefetchScalarGridSpec(
            num_scalar_prefetch=0,
            grid=(n // dst_tile, n // src_tile),   # src (reduction) axis innermost
            in_specs=[
                pl.BlockSpec((dst_tile, 2 * num_heads), lambda d, s: (d, 0)),
                pl.BlockSpec((num_heads, src_tile), lambda d, s: (0, s)),
                pl.BlockSpec((src_tile, hd), lambda d, s: (s, 0)),
            ],
            out_specs=pl.BlockSpec((dst_tile, hd), lambda d, s: (d, 0)),
            scratch_shapes=[
                pltpu.VMEM((dst_tile, num_heads), jnp.float32),   # softmax denominator
            ],
        ),
        compiler_params=pltpu.CompilerParams(
            dimension_semantics=("parallel", "arbitrary"),
            vmem_limit_bytes=32 * 1024 * 1024,
        ),
    )(sd, s_srcT, z_bf16)


# ---------------------------------------------------------------------------
# Forward wrapper: MultiHeadGATLayer(h) with merge='cat' (or 'mean').
# ---------------------------------------------------------------------------
def multi_head_gat_forward(x, fc_weights, attn_weights, *, num_heads, out_dim,
                           merge="cat", node_tile=128, dst_tile=128, src_tile=256):
    """x: (N, in_dim) f32.
       fc_weights:   (H, out_dim, in_dim)  -- torch fc.weight per head.
       attn_weights: (H, 2*out_dim)        -- torch attn_fc.weight per head (squeezed)."""
    n, in_dim = x.shape
    assert n % node_tile == 0 and n % dst_tile == 0 and n % src_tile == 0, (
        "N must be a multiple of the tile sizes (pad + mask otherwise).")

    # One wide all-heads projection weight (in_dim, H*D); column block h is W_h^T.
    w_z = jnp.transpose(fc_weights, (2, 0, 1)).reshape(in_dim, num_heads * out_dim)
    w_z = w_z.astype(jnp.bfloat16)

    # Fold the attention mat-vecs into the projection: s_{src,dst} = x @ (W_h^T a)
    a_src = attn_weights[:, :out_dim]                             # (H, D)
    a_dst = attn_weights[:, out_dim:]                             # (H, D)
    w_a_src = jnp.einsum("hdi,hd->ih", fc_weights, a_src)         # (in_dim, H)
    w_a_dst = jnp.einsum("hdi,hd->ih", fc_weights, a_dst)         # (in_dim, H)
    w_a = jnp.concatenate([w_a_src, w_a_dst], axis=1)             # (in_dim, 2H)

    z_bf16, s = _projection(x, w_z, w_a, node_tile=node_tile)
    s_src = s[:, :num_heads]                                      # (N, H)
    s_dst = s[:, num_heads:]                                      # (N, H)

    # leaky_relu is monotone increasing, so the softmax row max is known up
    # front: rowmax[v,h] = lrelu(s_dst[v,h] + max_u s_src[u,h]).  No online
    # softmax needed in the kernel.
    t = s_dst + jnp.max(s_src, axis=0)[None, :]
    row_max = jnp.maximum(t, NEG_SLOPE * t)                       # (N, H)
    sd = jnp.concatenate([s_dst, row_max], axis=1)                # (N, 2H)
    s_srcT = s_src.T                                              # (H, N): src scores lane-major

    out = _gat_attention(z_bf16, s_srcT, sd, num_heads=num_heads,
                         out_dim=out_dim, dst_tile=dst_tile, src_tile=src_tile)
    if merge == "cat":
        return out                                                # (N, H*D)
    # torch.mean(torch.stack(head_outs)) without dim == scalar mean over all elements
    return jnp.mean(out)


# ---------------------------------------------------------------------------
# Pure-JAX reference (f32), mirrors the PyTorch module on a dense graph.
# ---------------------------------------------------------------------------
def multi_head_gat_reference(x, fc_weights, attn_weights, num_heads, out_dim):
    outs = []
    for h in range(num_heads):
        z = x @ fc_weights[h].T                                   # (N, D)
        s_src = z @ attn_weights[h, :out_dim]                     # (N,)
        s_dst = z @ attn_weights[h, out_dim:]                     # (N,)
        e = s_dst[:, None] + s_src[None, :]                       # e[v, u]
        e = jnp.where(e > 0, e, NEG_SLOPE * e)
        alpha = jax.nn.softmax(e, axis=1)
        outs.append(alpha @ z)
    return jnp.concatenate(outs, axis=1)


if __name__ == "__main__":
    N, IN_DIM, OUT_DIM, HEADS = 256, 32, 32, 4                    # H*D = 128 (lane-dense)

    key = jax.random.PRNGKey(0)
    k1, k2, k3 = jax.random.split(key, 3)
    x = jax.random.normal(k1, (N, IN_DIM), jnp.float32)

    # xavier_normal_ with gain = calculate_gain('relu') = sqrt(2)
    gain = 2.0 ** 0.5
    fc_std = gain * (2.0 / (IN_DIM + OUT_DIM)) ** 0.5
    at_std = gain * (2.0 / (2 * OUT_DIM + 1)) ** 0.5
    fc_w = fc_std * jax.random.normal(k2, (HEADS, OUT_DIM, IN_DIM), jnp.float32)
    at_w = at_std * jax.random.normal(k3, (HEADS, 2 * OUT_DIM), jnp.float32)

    out = multi_head_gat_forward(x, fc_w, at_w, num_heads=HEADS, out_dim=OUT_DIM,
                                 node_tile=128, dst_tile=128, src_tile=256)
    out = jax.block_until_ready(out)

    ref = multi_head_gat_reference(x, fc_w, at_w, HEADS, OUT_DIM)
    max_err = float(jnp.max(jnp.abs(out - ref)))
    if not bool(jnp.allclose(out, ref, atol=4e-2, rtol=4e-2)):
        raise AssertionError(f"Pallas GAT mismatch vs reference, max abs err = {max_err}")
    print("KERNEL_OK")
</pallas_src>

<mosaic_0001>
module attributes {stable_mosaic.version = 11 : i64} {
  func.func @_proj_kernel(%arg0: i32, %arg1: memref<128x32xf32, #tpu.memory_space<vmem>>, %arg2: memref<32x128xbf16, #tpu.memory_space<vmem>>, %arg3: memref<32x8xf32, #tpu.memory_space<vmem>>, %arg4: memref<128x128xbf16, #tpu.memory_space<vmem>>, %arg5: memref<128x8xf32, #tpu.memory_space<vmem>>) attributes {dimension_semantics = [#tpu.dimension_semantics<parallel>], iteration_bounds = array<i64: 2>, scalar_prefetch = 0 : i64, scratch_operands = 0 : i64, tpu.core_type = #tpu.core_type<tc>, window_params = [{transform_indices = @transform_0, window_bounds = array<i64: 128, 32>}, {pipeline_mode = #tpu.pipeline_mode<synchronous>, transform_indices = @transform_1, window_bounds = array<i64: 32, 128>}, {pipeline_mode = #tpu.pipeline_mode<synchronous>, transform_indices = @transform_2, window_bounds = array<i64: 32, 8>}, {transform_indices = @transform_3, window_bounds = array<i64: 128, 128>}, {transform_indices = @transform_4, window_bounds = array<i64: 128, 8>}]} {
    %c0 = arith.constant 0 : index
    %c0_0 = arith.constant 0 : index
    %0 = vector.load %arg1[%c0, %c0_0] : memref<128x32xf32, #tpu.memory_space<vmem>>, vector<128x32xf32>
    %1 = arith.truncf %0 : vector<128x32xf32> to vector<128x32xbf16>
    %c0_1 = arith.constant 0 : index
    %c0_2 = arith.constant 0 : index
    %2 = vector.load %arg2[%c0_1, %c0_2] : memref<32x128xbf16, #tpu.memory_space<vmem>>, vector<32x128xbf16>
    %cst = arith.constant dense<0.000000e+00> : vector<128x128xf32>
    %3 = tpu.matmul %1, %2, %cst {dimension_numbers = #tpu.dot_dimension_numbers<[1], [0], [0], [1], [0, 0, 1, 1], [], []>} : vector<128x32xbf16>, vector<32x128xbf16>, vector<128x128xf32> -> vector<128x128xf32>
    %4 = arith.truncf %3 : vector<128x128xf32> to vector<128x128xbf16>
    %c0_3 = arith.constant 0 : index
    %c0_4 = arith.constant 0 : index
    %5 = vector.load %arg4[%c0_3, %c0_4] : memref<128x128xbf16, #tpu.memory_space<vmem>>, vector<128x128xbf16>
    tpu.vector_store %arg4[%c0_3, %c0_4], %4 {strides = array<i32>} : memref<128x128xbf16, #tpu.memory_space<vmem>>, vector<128x128xbf16>,
    %c0_5 = arith.constant 0 : index
    %c0_6 = arith.constant 0 : index
    %6 = vector.load %arg3[%c0_5, %c0_6] : memref<32x8xf32, #tpu.memory_space<vmem>>, vector<32x8xf32>
    %cst_7 = arith.constant dense<0.000000e+00> : vector<128x8xf32>
    %7 = tpu.matmul %0, %6, %cst_7 {dimension_numbers = #tpu.dot_dimension_numbers<[1], [0], [0], [1], [0, 0, 1, 1], [], []>} : vector<128x32xf32>, vector<32x8xf32>, vector<128x8xf32> -> vector<128x8xf32>
    %c0_8 = arith.constant 0 : index
    %c0_9 = arith.constant 0 : index
    %8 = vector.load %arg5[%c0_8, %c0_9] : memref<128x8xf32, #tpu.memory_space<vmem>>, vector<128x8xf32>
    tpu.vector_store %arg5[%c0_8, %c0_9], %7 {strides = array<i32>} : memref<128x8xf32, #tpu.memory_space<vmem>>, vector<128x8xf32>,
    return
  }
  func.func @transform_0(%arg0: i32) -> (i32, i32) {
    %c0_i32 = arith.constant 0 : i32
    %c0_i32_0 = arith.constant 0 : i32
    return %arg0, %c0_i32 : i32, i32
  }
  func.func @transform_1(%arg0: i32) -> (i32, i32) {
    %c0_i32 = arith.constant 0 : i32
    %c0_i32_0 = arith.constant 0 : i32
    %c0_i32_1 = arith.constant 0 : i32
    return %c0_i32, %c0_i32_0 : i32, i32
  }
  func.func @transform_2(%arg0: i32) -> (i32, i32) {
    %c0_i32 = arith.constant 0 : i32
    %c0_i32_0 = arith.constant 0 : i32
    %c0_i32_1 = arith.constant 0 : i32
    return %c0_i32, %c0_i32_0 : i32, i32
  }
  func.func @transform_3(%arg0: i32) -> (i32, i32) {
    %c0_i32 = arith.constant 0 : i32
    %c0_i32_0 = arith.constant 0 : i32
    return %arg0, %c0_i32 : i32, i32
  }
  func.func @transform_4(%arg0: i32) -> (i32, i32) {
    %c0_i32 = arith.constant 0 : i32
    %c0_i32_0 = arith.constant 0 : i32
    return %arg0, %c0_i32 : i32, i32
  }
}

</mosaic_0001>

<bundles_post_ra>
// kernel: tpu_custom_call.1
= control target key start
LH: loop header
LB: loop body
LE: loop exit
PB: predicated region body
PF: predicated region fallthrough
CT: control target
= control target key end

     0   :  { %10 = vsyncpa [#allocation3], 0  ;;  %s1346_s0 = inlined_call_operand.vmem [shape: f32[256,32], index: 0, kind: input, shape index: {}]   ;;  %s1347_s1 = inlined_call_operand.vmem [shape: bf16[32,128], index: 1, kind: input, shape index: {}]   ;;  %s1348_s2 = inlined_call_operand.vmem [shape: f32[32,8], index: 2, kind: input, shape index: {}]   ;;  %s1349_s3 = inlined_call_operand.hbm [shape: bf16[256,128], index: 3, kind: output, shape index: {0}]   ;;  %s1350_s4 = inlined_call_operand.vmem [shape: f32[256,8], index: 4, kind: output, shape index: {1}]  }
   0x1   :  { %12 = vsyncpa [#allocation3 + $0x1], 0  ;;  %s1125_s15 = smov 0   ;;  %s1127_s16 = smov 0  }
   0x2   :  { %s1129_s17 = smov 0   ;;  %s1131_s18 = smov 0  }
   0x3 LB: > { %s1146_s19 = sadd.s32 4294967295, %s1095_s18   ;;  %s780_s20 = sadd.s32 4294967294, %s1095_s18   ;;  %s1095_s18 = sphi %s1131_s18, %s1356_s18   ;;  %s1091_s17 = sphi %s1129_s17, %s1355_s17   ;;  %s1087_s16 = sphi %s1127_s16, %s1354_s16   ;;  %s1083_s15 = sphi %s1125_s15, %s1353_s15  }
   0x4   : > { %s1150_s21 = sadd.s32 1, %s1095_s18   ;;  %s93_s22 = sadd.s32 1, %s1091_s17 }
   0x5   : > { %s90_s23 = ssub.s32 %s1095_s18, %s1150_s21  ;;  %p103_p0 = scmp.ne.s32.totalorder %s1091_s17, %s1087_s16 }
   0x6   : > { %p91_p1 = scmp.eq.s32.totalorder %s90_s23, 0  ;;  %p104_p2 = scmp.eq.s32.totalorder %s1146_s19, 1 }
   0x7   : > { %p109_p3 = scmp.ne.s32.totalorder %s1087_s16, %s1083_s15  ;;  %p110_p4 = scmp.eq.s32.totalorder %s780_s20, 1 }
   0x8   : > { %s1161_s24 = scalar_select %p91_p1, %s1091_s17, %s93_s22  }
   0x9   : > { %p1163_p5 = por %p104_p2, %p103_p0  ;;  %p1167_p6 = por %p110_p4, %p109_p3 }
   0xa   : > { %p783_p7 = scmp.ge.s32.totalorder %s1095_s18, 1  ;;  %p169_p8 = scmp.lt.s32.totalorder %s1095_s18, 3 }
   0xc   : > { %p170_p9 = pnand %p783_p7, %p169_p8 }
   0xd   : > { %v1031_v0 = vld [vmem:[%s1347_s1] sm:$0xff] (!%p170_p9)   ;;  %s785_s29 = sshll.u32 (!%p170_p9), %s1146_s19, 4  ;;  %v457_v2 = vld [vmem:[%s1348_s2 + $0x8] sm:$0xff] (!%p170_p9)  ;;  %v458_v5 = vld [vmem:[%s1348_s2 + $0x10] sm:$0xff] (!%p170_p9)  ;;  %vm254_vm0 = vcmask (!%p170_p9), 261120   ;;  %s190_s27 = sand.u32 (!%p170_p9), 1, %s1087_s16  }
   0xe   : > { %173 = sbr.rel (%p170_p9) target bundleno = 284 (0x11c), region = 32  ;;  %v456_v1 = vld [vmem:[%s1348_s2] sm:$0xff] (!%p170_p9)  ;;  %p201_p10 = scmp.lt.s32.totalorder (!%p170_p9), %s785_s29, 31  ;;  %930 = vmatprep.subr.bf16.mxu0 (!%p170_p9), %v1031_v0  ;;  %v1032_v4 = vld [vmem:[%s1347_s1 + $0x8] sm:$0xff] (!%p170_p9)   ;;  %v459_v6 = vld [vmem:[%s1348_s2 + $0x18] sm:$0xff] (!%p170_p9)  ;;  %vm653_vm1 = vcmask (!%p170_p9), 64512  }
   0xf   : > { %v982_v3 = vpack.c.bf16 (!%p170_p9), %v457_v2, %v456_v1  ;;  %931 = vmatpush3.bf16.msra.mxu0 (!%p170_p9), %v1031_v0  ;;  %v986_v7 = vpack.c.bf16 (!%p170_p9), %v459_v6, %v458_v5  ;;  %s784_s6 = sshll.u32 (!%p170_p9), %s190_s27, 6  ;;  %s852_s7 = sshll.u32 (!%p170_p9), %s1146_s19, 10 }
  0x10   : > { %932 = vmatprep.subr.bf16.mxu0 (!%p170_p9), %v1032_v4  ;;  %s1293_s11 = scalar_lea.hbm (!%p170_p9), %s1349_s3, %s852_s7  ;;  %s1305_s19 = scalar_lea.sflag (!%p170_p9), [#allocation3], %s190_s27 }
  0x11   : > { %983 = vmatprep.subr.bf16.mxu1 (!%p170_p9), %v982_v3  ;;  %s1097_s13 = smov (!%p170_p9), [#allocation2]  }
  0x12   : > { %985 = vmatpush3.bf16.msra.mxu1 (!%p170_p9), %v982_v3 }
  0x13   : > { %987 = vmatprep.subr.bf16.mxu1 (!%p170_p9), %v986_v7  ;;  %933 = vmatpush3.bf16.msra.mxu0 (!%p170_p9), %v1032_v4 }
  0x15   : > { %s1358_s29 = smov (!%p201_p10, %s785_s29), 31 }
  0x16   : > { %s786_s14 = sshll.u32 %s1358_s29, 3  ;;  %989 = vmatpush3.bf16.msra.mxu1 %v986_v7  ;;  %s1256_s29 = scalar_lea.vmem [#allocation2], %s784_s6 }
  0x17   : > { %s1200_s23 = scalar_lea.vmem %s1346_s0, %s786_s14  ;;  %s1248_s5 = scalar_lea.vmem %s1350_s4, %s786_s14 }
  0x18   : > { %v214_v8 = vld [vmem:[%s1200_s23] sm:$0xff]  ;;  %v215_v9 = vld [vmem:[%s1200_s23 + $0x8] sm:$0xff]  ;;  %v216_v10 = vld [vmem:[%s1200_s23 + $0x10] sm:$0xff]  ;;  %s689_s8 = sshll.u32 %s1256_s29, 4  ;;  %s1037_s14 = sshll.u32 %s1097_s13, 4  ;;  %s1295_s8 = int_to_ptr.vmem [resolvable:$true] %s689_s8  ;;  %s1038_s14 = int_to_ptr.vmem [resolvable:$false] %s1037_s14 }
  0x19   : > { %v230_v11 = vpack.c.bf16 %v215_v9, %v214_v8  ;;  %958 = vmatprep.mubr.msk.f32.mxu1 %vm254_vm0, %v214_v8  ;;  %v217_v12 = vld [vmem:[%s1200_s23 + $0x18] sm:$0xff]  ;;  %v218_v13 = vld [vmem:[%s1200_s23 + $0x20] sm:$0xff]  ;;  %v219_v14 = vld [vmem:[%s1200_s23 + $0x28] sm:$0xff]  ;;  %s1033_s12 = scalar_lea.vmem %s1295_s8, 1024  ;;  %s1039_s20 = scalar_lea.vmem %s1038_s14, 2048 }
  0x1a   : > { %v231_v15 = vpack.c.bf16 %v217_v12, %v216_v10  ;;  %v232_v16 = vpack.c.bf16 %v219_v14, %v218_v13  ;;  %959 = vmatmul.mubr.msk.f32.vlgmr.msra.gmra.mrb[0].mxu1 %vm254_vm0, %v215_v9  ;;  %v220_v17 = vld [vmem:[%s1200_s23 + $0x30] sm:$0xff]  ;;  %v221_v18 = vld [vmem:[%s1200_s23 + $0x38] sm:$0xff]  ;;  %v222_v19 = vld [vmem:[%s1200_s23 + $0x40] sm:$0xff]  ;;  %p1034_p11 = scmp.ne.s32.totalorder %s1295_s8, %s1033_s12  ;;  %p1040_p0 = scmp.lt.s32.totalorder %s1295_s8, %s1038_s14 }
  0x1b   : > { %934 = vmatprep.mubr.msk.bf16.mxu0 %vm254_vm0, %v230_v11  ;;  %961 = vmatprep.mubr.msk.f32.mxu1 %vm254_vm0, %v216_v10  ;;  %v223_v20 = vld [vmem:[%s1200_s23 + $0x48] sm:$0xff]  ;;  %v233_v21 = vpack.c.bf16 %v221_v18, %v220_v17  ;;  %v224_v23 = vld [vmem:[%s1200_s23 + $0x50] sm:$0xff]  ;;  %v225_v24 = vld [vmem:[%s1200_s23 + $0x58] sm:$0xff]  ;;  %p1041_p1 = scmp.lt.s32.totalorder %s1039_s20, %s1033_s12 }
  0x1c   : > { %935 = vmatmul.mubr.msk.bf16.vlgmr.msra.gmra.mrb[0].mxu0 %vm254_vm0, %v231_v15  ;;  %v234_v22 = vpack.c.bf16 %v223_v20, %v222_v19  ;;  %v226_v25 = vld [vmem:[%s1200_s23 + $0x60] sm:$0xff]  ;;  %v227_v26 = vld [vmem:[%s1200_s23 + $0x68] sm:$0xff]  ;;  %v235_v27 = vpack.c.bf16 %v225_v24, %v224_v23  ;;  %v228_v29 = vld [vmem:[%s1200_s23 + $0x70] sm:$0xff]  ;;  %p1035_p12 = pnand %p1034_p11, %p1163_p5 }
  0x1d   : > { %938 = vmatprep.mubr.msk.bf16.mxu0 %vm254_vm0, %v232_v16  ;;  %v236_v28 = vpack.c.bf16 %v227_v26, %v226_v25  ;;  %v229_v30 = vld [vmem:[%s1200_s23 + $0x78] sm:$0xff]  ;;  %p1042_p2 = por %p1041_p1, %p1040_p0 }
  0x1e   : > { %962 = vmatmul.mubr.msk.f32.gmra.mrb[2].mxu1 %vm254_vm0, %v217_v12  ;;  %v237_v31 = vpack.c.bf16 %v229_v30, %v228_v29  ;;  %p1036_p13 = pneg %p1035_p12 }
  0x1f   : > { %964 = vmatprep.mubr.msk.f32.mxu1 %vm254_vm0, %v218_v13 }
  0x20   : > { %p1043_p3 = pnand %p1042_p2, %p1036_p13 }
  0x22   : > { %965 = vmatmul.mubr.msk.f32.gmra.mrb[4].mxu1 %vm254_vm0, %v219_v14 }
  0x23   : > { %967 = vmatprep.mubr.msk.f32.mxu1 %vm254_vm0, %v220_v17 }
  0x24   : > { %939 = vmatmul.mubr.msk.bf16.gmra.mrb[4].mxu0 %vm254_vm0, %v233_v21 }
  0x25   : > { %942 = vmatprep.mubr.msk.bf16.mxu0 %vm254_vm0, %v234_v22 }
  0x26   : > { %968 = vmatmul.mubr.msk.f32.gmra.mrb[6].mxu1 %vm254_vm0, %v221_v18 }
  0x27   : > { %970 = vmatprep.mubr.msk.f32.mxu1 %vm254_vm0, %v222_v19 }
  0x2a   : > { %971 = vmatmul.mubr.msk.f32.gmra.mrb[8].mxu1 %vm254_vm0, %v223_v20 }
  0x2b   : > { %973 = vmatprep.mubr.msk.f32.mxu1 %vm254_vm0, %v224_v23 }
  0x2c   : > { %943 = vmatmul.mubr.msk.bf16.gmra.mrb[8].mxu0 %vm254_vm0, %v235_v27 }
  0x2d   : > { %946 = vmatprep.mubr.msk.bf16.mxu0 %vm254_vm0, %v236_v28 }
  0x2e   : > { %974 = vmatmul.mubr.msk.f32.gmra.mrb[10].mxu1 %vm254_vm0, %v225_v24 }
  0x2f   : > { %976 = vmatprep.mubr.msk.f32.mxu1 %vm254_vm0, %v226_v25 }
  0x32   : > { %977 = vmatmul.mubr.msk.f32.gmra.mrb[12].mxu1 %vm254_vm0, %v227_v26 }
  0x33   : > { %979 = vmatprep.mubr.msk.f32.mxu1 %vm254_vm0, %v228_v29 }
  0x34   : > { %947 = vmatmul.mubr.msk.bf16.gmra.mrb[12].mxu0 %vm254_vm0, %v237_v31 }
  0x36   : > { %980 = vmatmul.mubr.msk.f32.gmra.mrb[14].mxu1 %vm254_vm0, %v229_v30 }
  0xed   : > { %v960_v33 = vpop.f32.mrb[0].mxu1 }
  0xee   : > { %655 = vst.msk [vmem:[%s1248_s5 + $0x8] sm:$0xff] %vm653_vm1, %v960_v33  ;;  %v574_v35 = vpop.f32.mrb[1].mxu1 }
  0xef   : > { %v936_v32 = vpop.f32.mrb[0].mxu0  ;;  %654 = vst.msk [vmem:[%s1248_s5] sm:$0xff] %vm653_vm1, %v574_v35 }
  0xf0   : > { %v313_v34 = vpop.f32.mrb[1].mxu0 }
  0xf1   : > { %v937_v36 = vpop.f32.mrb[2].mxu0  ;;  %v963_v40 = vpop.f32.mrb[2].mxu1 }
  0xf2   : > { %v861_v37 = vpack.c.bf16 %v937_v36, %v936_v32  ;;  %v316_v38 = vpop.f32.mrb[3].mxu0  ;;  %657 = vst.msk [vmem:[%s1248_s5 + $0x18] sm:$0xff] %vm653_vm1, %v963_v40  ;;  %v584_v41 = vpop.f32.mrb[3].mxu1 }
  0xf3   : > { %v856_v39 = vpack.c.bf16 %v316_v38, %v313_v34  ;;  %656 = vst.msk [vmem:[%s1248_s5 + $0x10] sm:$0xff] %vm653_vm1, %v584_v41 }
  0xf4   : > { %893 = vst [vmem:[%s1256_s29 + $0x8] sm:$0xff] %v861_v37  }
  0xf5   : > { %857 = vst [vmem:[%s1256_s29] sm:$0xff] %v856_v39   ;;  %v966_v43 = vpop.f32.mrb[4].mxu1 }
  0xf6   : > { %659 = vst.msk [vmem:[%s1248_s5 + $0x28] sm:$0xff] %vm653_vm1, %v966_v43  ;;  %v594_v45 = vpop.f32.mrb[5].mxu1 }
  0xf7   : > { %v940_v42 = vpop.f32.mrb[4].mxu0  ;;  %658 = vst.msk [vmem:[%s1248_s5 + $0x20] sm:$0xff] %vm653_vm1, %v594_v45 }
  0xf8   : > { %v329_v44 = vpop.f32.mrb[5].mxu0 }
  0xf9   : > { %v941_v46 = vpop.f32.mrb[6].mxu0  ;;  %v969_v50 = vpop.f32.mrb[6].mxu1 }
  0xfa   : > { %v871_v47 = vpack.c.bf16 %v941_v46, %v940_v42  ;;  %v332_v48 = vpop.f32.mrb[7].mxu0  ;;  %661 = vst.msk [vmem:[%s1248_s5 + $0x38] sm:$0xff] %vm653_vm1, %v969_v50  ;;  %v604_v51 = vpop.f32.mrb[7].mxu1 }
  0xfb   : > { %v866_v49 = vpack.c.bf16 %v332_v48, %v329_v44  ;;  %660 = vst.msk [vmem:[%s1248_s5 + $0x30] sm:$0xff] %vm653_vm1, %v604_v51 }
  0xfc   : > { %895 = vst [vmem:[%s1256_s29 + $0x18] sm:$0xff] %v871_v47  }
  0xfd   : > { %894 = vst [vmem:[%s1256_s29 + $0x10] sm:$0xff] %v866_v49   ;;  %v972_v53 = vpop.f32.mrb[8].mxu1 }
  0xfe   : > { %663 = vst.msk [vmem:[%s1248_s5 + $0x48] sm:$0xff] %vm653_vm1, %v972_v53  ;;  %v614_v55 = vpop.f32.mrb[9].mxu1 }
  0xff   : > { %v944_v52 = vpop.f32.mrb[8].mxu0  ;;  %662 = vst.msk [vmem:[%s1248_s5 + $0x40] sm:$0xff] %vm653_vm1, %v614_v55 }
 0x100   : > { %v345_v54 = vpop.f32.mrb[9].mxu0 }
 0x101   : > { %v945_v56 = vpop.f32.mrb[10].mxu0  ;;  %v975_v60 = vpop.f32.mrb[10].mxu1 }
 0x102   : > { %v881_v57 = vpack.c.bf16 %v945_v56, %v944_v52  ;;  %v348_v58 = vpop.f32.mrb[11].mxu0  ;;  %665 = vst.msk [vmem:[%s1248_s5 + $0x58] sm:$0xff] %vm653_vm1, %v975_v60  ;;  %v624_v61 = vpop.f32.mrb[11].mxu1 }
 0x103   : > { %v876_v59 = vpack.c.bf16 %v348_v58, %v345_v54  ;;  %664 = vst.msk [vmem:[%s1248_s5 + $0x50] sm:$0xff] %vm653_vm1, %v624_v61 }
 0x104   : > { %897 = vst [vmem:[%s1256_s29 + $0x28] sm:$0xff] %v881_v57  }
 0x105   : > { %896 = vst [vmem:[%s1256_s29 + $0x20] sm:$0xff] %v876_v59   ;;  %v978_v63 = vpop.f32.mrb[12].mxu1 }
 0x106   : > { %667 = vst.msk [vmem:[%s1248_s5 + $0x68] sm:$0xff] %vm653_vm1, %v978_v63  ;;  %v634_v1 = vpop.f32.mrb[13].mxu1 }
 0x107   : > { %v948_v62 = vpop.f32.mrb[12].mxu0  ;;  %666 = vst.msk [vmem:[%s1248_s5 + $0x60] sm:$0xff] %vm653_vm1, %v634_v1 }
 0x108   : > { %v361_v0 = vpop.f32.mrb[13].mxu0 }
 0x109   : > { %v949_v2 = vpop.f32.mrb[14].mxu0  ;;  %v981_v6 = vpop.f32.mrb[14].mxu1 }
 0x10a   : > { %v891_v3 = vpack.c.bf16 %v949_v2, %v948_v62  ;;  %v364_v4 = vpop.f32.mrb[15].mxu0  ;;  %669 = vst.msk [vmem:[%s1248_s5 + $0x78] sm:$0xff] %vm653_vm1, %v981_v6  ;;  %v644_v7 = vpop.f32.mrb[15].mxu1 }
 0x10b   : > { %v886_v5 = vpack.c.bf16 %v364_v4, %v361_v0  ;;  %668 = vst.msk [vmem:[%s1248_s5 + $0x70] sm:$0xff] %vm653_vm1, %v644_v7 }
 0x10c   : > { %899 = vst [vmem:[%s1256_s29 + $0x38] sm:$0xff] %v891_v3  }
 0x10d   : > { %898 = vst [vmem:[%s1256_s29 + $0x30] sm:$0xff] %v886_v5  }
 0x10e   : > { %1046 = shalt.err (!%p1043_p3)
}
 0x10f   : > { %s1047_s22 = scalar_lea.hbm %s1293_s11, 1024  ;;  %s1051_s28 = scalar_lea.hbm %s1349_s3, 2048 }
 0x110   : > { %p1048_p4 = scmp.ne.s32.totalorder %s1293_s11, %s1047_s22  ;;  %p1052_p9 = scmp.lt.u32.totalorder %s1293_s11, %s1349_s3 }
 0x111   : > { %p1053_p10 = scmp.lt.u32.totalorder %s1051_s28, %s1047_s22  ;;  %p1055_p12 = scmp.lt.u32.totalorder %s1047_s22, %s1293_s11 }
 0x112   : > { %p1049_p7 = pnand %p1048_p4, %p1163_p5 }
 0x113   : > { %p1054_p11 = por %p1053_p10, %p1052_p9 }
 0x114   : > { %p1050_p8 = pneg %p1049_p7 }
 0x115   : > { %p1056_p13 = por %p1055_p12, %p1054_p11 }
 0x117   : > { %p1057_p0 = pnand %p1056_p13, %p1050_p8 }
 0x119   : > { %1060 = shalt.err (!%p1057_p0)
}
 0x11a   : > { %s1098_s6 = smov 64   ;;  %s1099_s29 = smov 4  }
 0x11b   : > { %990 = dma.vmem_to_hbm [thread:$0]  (%p1163_p5), %s1295_s8, 1024, %s1293_s11, %s1305_s19, %s1098_s6, %s1098_s6, %s1099_s29  }
 0x11c PF: > { %p996_p1 = scmp.ge.s32.totalorder %s1095_s18, 2  ;;  %s708_s7 = sand.u32 1, %s1083_s15  }
 0x11d   : > { %s709_s9 = scalar_lea.sflag [#allocation3], %s708_s7 }
 0x11e   : > { %p993_p2 = pnand %p996_p1, %p1167_p6 }
 0x120   : > { %1078 = dma.done.wait (!%p993_p2), %s709_s9, 1024  }
 0x121   : > { %1080 = vsyncadd (!%p993_p2), %s709_s9, 4294966272  ;;  %p15_p3 = scmp.ge.s32.totalorder %s1150_s21, 4   ;;  %s1353_s15 = smov %s1087_s16 }
 0x122   : > { %s1354_s16 = smov %s1091_s17  ;;  %s1355_s17 = smov %s1161_s24 }
 0x123   : > { %s1356_s18 = smov %s1150_s21  ;;  %17 = sbr.rel (!%p15_p3) target bundleno = 3 (0x3), region = 79 }
 0x12a   :  { %722 = vsyncpa [#allocation3], 1 }
 0x12b   :  { %724 = vsyncpa [#allocation3 + $0x1], 1 }

</bundles_post_ra>
